<compile_context>
chip_gen: v6e
topology: v6e:2x2x1
jax: 0.10.0
libtpu: 0.0.40
codegen_flags: <defaults>
</compile_context>

<pallas_src>
import functools
import math

import jax
import jax.numpy as jnp
from jax import lax
from jax.experimental import pallas as pl
from jax.experimental.pallas import tpu as pltpu


_VMEM_LIMIT_BYTES = 48 * 1024 * 1024   # raised scoped-VMEM limit; < v7x's 64 MiB physical
_PROJ_VMEM_BUDGET = 20 * 1024 * 1024   # target double-buffered working set (projection)
_ATTN_VMEM_BUDGET = 24 * 1024 * 1024   # target double-buffered working set (attention)


def _dsize(dt):
    return jnp.dtype(dt).itemsize


# ----------------------------------------------------------------------------
# VMEM-budget-aware tile selection
# ----------------------------------------------------------------------------

def _proj_tiles(L, d_out, d_in, *, x_bytes, w_bytes, out_bytes, rope, head_dim, budget):
    tm_c = [c for c in (512, 256, 128, 64, 32, 16, 8) if L % c == 0] or [L]
    tn_c = [c for c in (512, 256, 128) if d_out % c == 0] or [d_out]
    tk_c = [c for c in (512, 256, 128) if d_in % c == 0] or [d_in]
    if rope:
        # RoPE period table must tile the output column block.
        tn_c = [c for c in tn_c if c % head_dim == 0] or [d_out]
    for tm in tm_c:
        for tn in tn_c:
            for tk in tk_c:
                use = (2 * tm * tk * x_bytes          # x block (double-buffered)
                       + 2 * tk * tn * w_bytes        # W block
                       + 2 * tm * tn * out_bytes      # out block
                       + tm * tn * 4                  # f32 accumulator scratch
                       + 2 * tn * 4)                  # bias
                if rope:
                    use += 3 * 2 * tm * tn * 4        # cos / sinA / sinB period tables
                if use <= budget:
                    return tm, tn, tk
    return tm_c[-1], tn_c[-1], tk_c[-1]


def _attn_tiles(bz, Lq, Lk, d_model, *, in_bytes, mask_bytes, out_bytes, budget):
    tq_c = [c for c in (256, 128, 64, 32, 16, 8) if Lq % c == 0] or [Lq]
    tk_c = [c for c in (512, 256, 128, 64, 32, 16, 8) if Lk % c == 0] or [Lk]
    # v7x has 2 TensorCores: keep >= 2 parallel grid steps when batch is 1.
    if bz == 1:
        tq_par = [c for c in tq_c if Lq // c >= 2]
        if tq_par:
            tq_c = tq_par
    for tq in tq_c:
        for tk in tk_c:
            use = (2 * tq * d_model * in_bytes        # Q block
                   + 4 * tk * d_model * in_bytes      # K + V blocks
                   + 2 * tq * tk * mask_bytes         # mask block
                   + 2 * tq * d_model * out_bytes     # out block
                   + tq * d_model * 4)                # f32 accumulator scratch
            if use <= budget:
                return tq, tk
    return tq_c[-1], tk_c[-1]


# ----------------------------------------------------------------------------
# RoPE helpers
# ----------------------------------------------------------------------------

def precompute_freqs_cos_sin(dim, end, theta=10000.0):
    freqs = 1.0 / (theta ** (jnp.arange(0, dim, 2)[: dim // 2].astype(jnp.float32) / dim))
    t = jnp.arange(end, dtype=jnp.float32)
    ang = jnp.outer(t, freqs)          # (end, dim//2)
    return jnp.cos(ang), jnp.sin(ang)


def _rope_head_tables(cos, sin):
    """(L, hd//2) cos/sin -> three (L, hd) tables for roll-based interleaved RoPE:

        rope(y) = y * cos_t + roll(y, -1) * sa_t + roll(y, +1) * sb_t

    cos_t[2i] = cos_t[2i+1] = cos_i
    sa_t[2i]  = -sin_i, sa_t[2i+1] = 0
    sb_t[2i+1] = +sin_i, sb_t[2i]  = 0
    Wrap-around elements of the circular rolls are always multiplied by the zero
    entries of sa_t/sb_t, so the roll boundary never leaks across heads/pairs.
    """
    L, half = cos.shape
    z = jnp.zeros_like(sin)
    cos_t = jnp.repeat(cos, 2, axis=-1)                         # (L, hd)
    sa_t = jnp.stack([-sin, z], axis=-1).reshape(L, 2 * half)   # (L, hd)
    sb_t = jnp.stack([z, sin], axis=-1).reshape(L, 2 * half)    # (L, hd)
    return (cos_t.astype(jnp.float32), sa_t.astype(jnp.float32),
            sb_t.astype(jnp.float32))


def _pair_shift_terms(y):
    """Return (y[j+1], y[j-1]) along the lane axis.

    Uses the XLU rotate when the lane width is 128-aligned; falls back to
    jnp.roll (static slice + concat) for small/unaligned tiles.  Wrapped
    boundary values are irrelevant (multiplied by zeros in the sin tables)."""
    w = y.shape[-1]
    if w % 128 == 0:
        return pltpu.roll(y, w - 1, axis=-1), pltpu.roll(y, 1, axis=-1)
    return jnp.roll(y, -1, axis=-1), jnp.roll(y, 1, axis=-1)


# ----------------------------------------------------------------------------
# Tiled Linear (+ optional fused RoPE) kernel
# ----------------------------------------------------------------------------

def _proj_kernel(x_ref, w_ref, b_ref, *rest, apply_rope, compute_dtype):
    if apply_rope:
        cos_ref, sa_ref, sb_ref, o_ref, acc_ref = rest
    else:
        o_ref, acc_ref = rest

    k_idx = pl.program_id(3)

    @pl.when(k_idx == 0)
    def _init():
        acc_ref[...] = jnp.zeros_like(acc_ref)

    x = x_ref[0].astype(compute_dtype)          # (tm, tk)
    w = w_ref[...].astype(compute_dtype)        # (tk, tn)
    acc_ref[...] += jnp.dot(x, w, preferred_element_type=jnp.float32)

    @pl.when(k_idx == pl.num_programs(3) - 1)
    def _finalize():
        y = acc_ref[...] + b_ref[...].astype(jnp.float32)       # (tm, tn) f32
        if apply_rope:
            # Interleaved-pair RoPE via two lane rolls (XLU) + VPU FMAs.
            y_next, y_prev = _pair_shift_terms(y)
            y = y * cos_ref[...] + y_next * sa_ref[...] + y_prev * sb_ref[...]
        o_ref[0] = y.astype(o_ref.dtype)


def pallas_linear(x, w, b, rope_tables=None, *, head_dim=None,
                  compute_dtype=jnp.float32, out_dtype=None):
    """y = x @ w.T + b (PyTorch nn.Linear layout), optionally followed by fused RoPE.

    x           : (bz, L, d_in)
    w           : (d_out, d_in)   (PyTorch layout; transposed once on the host)
    b           : (d_out,)
    rope_tables : None or (cos_t, sa_t, sb_t), each (L, head_dim)
    """
    bz, L, d_in = x.shape
    d_out = w.shape[0]
    if out_dtype is None:
        out_dtype = x.dtype

    wt = jnp.asarray(w).T                                   # (d_in, d_out)
    if compute_dtype != jnp.float32:
        wt = wt.astype(compute_dtype)                       # halve weight DMA
        x = x.astype(compute_dtype)                         # halve activation DMA
    b2 = jnp.asarray(b).reshape(1, d_out).astype(jnp.float32)

    apply_rope = rope_tables is not None
    hd = head_dim if apply_rope else 1
    tm, tn, tk = _proj_tiles(L, d_out, d_in,
                             x_bytes=_dsize(x.dtype), w_bytes=_dsize(wt.dtype),
                             out_bytes=_dsize(out_dtype),
                             rope=apply_rope, head_dim=hd,
                             budget=_PROJ_VMEM_BUDGET)
    grid = (bz, L // tm, d_out // tn, d_in // tk)

    in_specs = [
        pl.BlockSpec((1, tm, tk), lambda bb, i, j, kk: (bb, i, kk)),
        pl.BlockSpec((tk, tn), lambda bb, i, j, kk: (kk, j)),
        pl.BlockSpec((1, tn), lambda bb, i, j, kk: (0, j)),
    ]
    args = [x, wt, b2]
    if apply_rope:
        assert d_out % head_dim == 0 and head_dim % 2 == 0 and tn % head_dim == 0
        reps = tn // head_dim
        # The RoPE pattern repeats every head_dim output columns; one (L, tn)
        # period slab (constant column-block index) replaces full (L, d_model)
        # tables -> n_heads x less HBM footprint and table DMA.
        tables = [jnp.tile(t, (1, reps)) for t in rope_tables]   # (L, tn) each
        table_spec = pl.BlockSpec((tm, tn), lambda bb, i, j, kk: (i, 0))
        in_specs += [table_spec, table_spec, table_spec]
        args += tables

    kern = functools.partial(_proj_kernel, apply_rope=apply_rope,
                             compute_dtype=compute_dtype)
    return pl.pallas_call(
        kern,
        out_shape=jax.ShapeDtypeStruct((bz, L, d_out), out_dtype),
        grid=grid,
        in_specs=in_specs,
        out_specs=pl.BlockSpec((1, tm, tn), lambda bb, i, j, kk: (bb, i, j)),
        scratch_shapes=[pltpu.VMEM((tm, tn), jnp.float32)],
        compiler_params=pltpu.CompilerParams(
            dimension_semantics=("parallel", "parallel", "parallel", "arbitrary"),
            vmem_limit_bytes=_VMEM_LIMIT_BYTES),
    )(*args)


# ----------------------------------------------------------------------------
# Flash-attention kernel (all heads packed along the lane-dense d_model axis)
# ----------------------------------------------------------------------------

def _flash_attn_kernel(q_ref, k_ref, v_ref, mask_ref, o_ref,
                       acc_scr, m_scr, l_scr, *,
                       n_heads, head_dim, compute_dtype, approx_recip):
    ki = pl.program_id(2)
    nk = pl.num_programs(2)

    @pl.when(ki == 0)
    def _init():
        acc_scr[...] = jnp.zeros_like(acc_scr)
        l_scr[...] = jnp.zeros_like(l_scr)
        m_scr[...] = jnp.full(m_scr.shape, -jnp.inf, dtype=m_scr.dtype)

    mask = mask_ref[0].astype(jnp.float32)                  # (tq, tk) additive
    rows = mask.shape[0]
    m_prev = m_scr[...]                                     # (tq, n_heads)
    l_prev = l_scr[...]                                     # (tq, n_heads)

    # TODO(synk): when head_dim is a multiple of 128, heads could become a grid
    # axis to avoid non-128-aligned lane slices of q/k/v below.
    m_parts, l_parts, alpha_parts, pv_parts = [], [], [], []
    for h in range(n_heads):
        lo, hi = h * head_dim, (h + 1) * head_dim
        qh = q_ref[0, :, lo:hi].astype(compute_dtype)       # (tq, hd)
        kh = k_ref[0, :, lo:hi].astype(compute_dtype)       # (tk, hd)
        vh = v_ref[0, :, lo:hi].astype(compute_dtype)       # (tk, hd)
        s = lax.dot_general(                                # (tq, tk) f32 scores
            qh, kh, dimension_numbers=(((1,), (1,)), ((), ())),
            preferred_element_type=jnp.float32) + mask

        m_h = m_prev[:, h:h + 1]                            # (tq, 1)
        m_new = jnp.maximum(m_h, jnp.max(s, axis=-1, keepdims=True))
        alpha = jnp.exp(m_h - m_new)
        p = jnp.exp(s - m_new)                              # (tq, tk) f32
        l_new = alpha * l_prev[:, h:h + 1] + jnp.sum(p, axis=-1, keepdims=True)
        pv = jnp.dot(p.astype(compute_dtype), vh,
                     preferred_element_type=jnp.float32)    # (tq, hd)
        m_parts.append(m_new)
        l_parts.append(l_new)
        alpha_parts.append(alpha)
        pv_parts.append(pv)

    # Single full-width (lane-dense) scratch updates per KV step -- no per-head
    # masked vst.msk partial stores.
    pv_full = jnp.concatenate(pv_parts, axis=-1)            # (tq, d_model)
    alpha_full = jnp.concatenate(
        [jnp.broadcast_to(a, (rows, head_dim)) for a in alpha_parts], axis=-1)
    acc_scr[...] = alpha_full * acc_scr[...] + pv_full
    m_scr[...] = jnp.concatenate(m_parts, axis=-1)
    l_scr[...] = jnp.concatenate(l_parts, axis=-1)

    @pl.when(ki == nk - 1)
    def _finalize():
        inv = pl.reciprocal(l_scr[...], approx=approx_recip)       # (tq, n_heads)
        inv_full = jnp.concatenate(
            [jnp.broadcast_to(inv[:, h:h + 1], (inv.shape[0], head_dim))
             for h in range(n_heads)], axis=-1)
        o_ref[0] = (acc_scr[...] * inv_full).astype(o_ref.dtype)   # one dense store


def flash_attention(q, k, v, mask3, *, n_heads, compute_dtype=jnp.float32):
    """q,k,v: (bz, L, d_model); mask3: (mb, Lq, Lk) additive, mb in {1, bz}."""
    bz, Lq, d_model = q.shape
    Lk = k.shape[1]
    assert d_model % n_heads == 0
    hd = d_model // n_heads
    mb = mask3.shape[0]
    assert mb in (1, bz)

    tq, tk = _attn_tiles(bz, Lq, Lk, d_model,
                         in_bytes=_dsize(q.dtype), mask_bytes=_dsize(mask3.dtype),
                         out_bytes=_dsize(q.dtype), budget=_ATTN_VMEM_BUDGET)
    grid = (bz, Lq // tq, Lk // tk)

    if mb == 1:
        mask_map = lambda b, qi, ki: (0, qi, ki)
    else:
        mask_map = lambda b, qi, ki: (b, qi, ki)

    # TODO(synk): skipping fully-masked KV tiles (causal tile-skip) would need the
    # mask structure as scalar-prefetch metadata; not implemented for runtime masks.
    kern = functools.partial(_flash_attn_kernel, n_heads=n_heads, head_dim=hd,
                             compute_dtype=compute_dtype,
                             approx_recip=(compute_dtype != jnp.float32))
    return pl.pallas_call(
        kern,
        out_shape=jax.ShapeDtypeStruct((bz, Lq, d_model), q.dtype),
        grid=grid,
        in_specs=[
            pl.BlockSpec((1, tq, d_model), lambda b, qi, ki: (b, qi, 0)),
            pl.BlockSpec((1, tk, d_model), lambda b, qi, ki: (b, ki, 0)),
            pl.BlockSpec((1, tk, d_model), lambda b, qi, ki: (b, ki, 0)),
            pl.BlockSpec((1, tq, tk), mask_map),
        ],
        out_specs=pl.BlockSpec((1, tq, d_model), lambda b, qi, ki: (b, qi, 0)),
        scratch_shapes=[
            pltpu.VMEM((tq, d_model), jnp.float32),   # output accumulator
            pltpu.VMEM((tq, n_heads), jnp.float32),   # running max  (per head)
            pltpu.VMEM((tq, n_heads), jnp.float32),   # running sum  (per head)
        ],
        compiler_params=pltpu.CompilerParams(
            dimension_semantics=("parallel", "parallel", "arbitrary"),
            vmem_limit_bytes=_VMEM_LIMIT_BYTES),
    )(q, k, v, mask3)


# ----------------------------------------------------------------------------
# SDPA module forward (wrapper calling the Pallas kernels)
# ----------------------------------------------------------------------------

def init_sdpa_params(key, d_model):
    ks = jax.random.split(key, 8)
    bound = 1.0 / math.sqrt(d_model)

    def lin(kw, kb):
        w = jax.random.uniform(kw, (d_model, d_model), jnp.float32, -bound, bound)
        b = jax.random.uniform(kb, (d_model,), jnp.float32, -bound, bound)
        return w, b

    wq, bq = lin(ks[0], ks[1])
    wk, bk = lin(ks[2], ks[3])
    wv, bv = lin(ks[4], ks[5])
    wf, bf = lin(ks[6], ks[7])
    return dict(w_q=wq, b_q=bq, w_k=wk, b_k=bk, w_v=wv, b_v=bv, fc_w=wf, fc_b=bf)


def sdpa_forward(params, Q, K, V, mask, cos=None, sin=None, *, n_heads,
                 dropout=0.0, compute_dtype=jnp.bfloat16):
    bz, Lq, d_model = Q.shape
    Lk = K.shape[1]
    assert d_model % n_heads == 0
    hd = d_model // n_heads
    scale = math.sqrt(hd)   # PyTorch SDPA `scale=` multiplies Q K^T.

    # bf16 mode keeps intermediate activations / MXU operands in bf16 (halves DMA
    # and uses the bf16-native MXU); mask add, softmax and accumulation stay f32.
    inter_dtype = compute_dtype if compute_dtype != jnp.float32 else Q.dtype

    rope_tables = _rope_head_tables(cos, sin) if cos is not None else None

    # Q/K/V projections.  RoPE is fused into the q/k projection epilogues, and
    # the sqrt(hd) SDPA scale is folded into the Q weights (RoPE is linear, so
    # scaling commutes) -- no per-score scaling in the attention kernel.
    q = pallas_linear(Q, params["w_q"] * scale, params["b_q"] * scale,
                      rope_tables, head_dim=hd,
                      compute_dtype=compute_dtype, out_dtype=inter_dtype)
    k = pallas_linear(K, params["w_k"], params["b_k"],
                      rope_tables, head_dim=hd,
                      compute_dtype=compute_dtype, out_dtype=inter_dtype)
    v = pallas_linear(V, params["w_v"], params["b_v"],
                      compute_dtype=compute_dtype, out_dtype=inter_dtype)

    # Additive mask, de-duplicated over heads: (mb, Lq, Lk) with mb in {1, bz}.
    m = jnp.asarray(mask)
    if m.dtype == jnp.bool_:
        m = jnp.where(m, 0.0, -1e9)
    m = m.astype(jnp.float32)
    m = jnp.maximum(m, jnp.float32(-1e9))   # guard -inf rows (NaN in online softmax)
    while m.ndim < 4:
        m = m[None]
    # TODO(synk): per-head (non-broadcast) attention masks are not supported by the
    # fused all-heads-per-block attention kernel.
    assert m.shape[1] == 1, "per-head attention masks not supported"
    m3 = jnp.broadcast_to(m[:, 0], (m.shape[0], Lq, Lk))

    # TODO(synk): training-mode attention dropout (dropout_p > 0) not implemented.
    ctx = flash_attention(q, k, v, m3, n_heads=n_heads, compute_dtype=compute_dtype)

    # Output projection back to the module dtype.
    return pallas_linear(ctx, params["fc_w"], params["fc_b"],
                         compute_dtype=compute_dtype, out_dtype=Q.dtype)


# ----------------------------------------------------------------------------
# Pure-JAX reference (for correctness check)
# ----------------------------------------------------------------------------

def apply_rotary_emb(xq, xk, cos, sin):
    """Pure-JAX rotary embedding (interleaved pairs), used only by the reference."""
    def rot(x):
        xs = x.astype(jnp.float32).reshape(*x.shape[:-1], -1, 2)
        xr, xi = xs[..., 0], xs[..., 1]
        c = cos.reshape(1, x.shape[1], 1, -1)
        s = sin.reshape(1, x.shape[1], 1, -1)
        o_r = xr * c - xi * s
        o_i = xr * s + xi * c
        return jnp.stack([o_r, o_i], axis=-1).reshape(*x.shape).astype(x.dtype)
    return rot(xq), rot(xk)


def sdpa_reference(params, Q, K, V, mask, cos, sin, *, n_heads):
    bz, Lq, d_model = Q.shape
    Lk = K.shape[1]
    hd = d_model // n_heads
    scale = math.sqrt(hd)

    q = (Q @ params["w_q"].T + params["b_q"]).reshape(bz, Lq, n_heads, hd)
    k = (K @ params["w_k"].T + params["b_k"]).reshape(bz, Lk, n_heads, hd)
    v = (V @ params["w_v"].T + params["b_v"]).reshape(bz, Lk, n_heads, hd)
    if cos is not None:
        q, k = apply_rotary_emb(q, k, cos, sin)
    q = q.transpose(0, 2, 1, 3)
    k = k.transpose(0, 2, 1, 3)
    v = v.transpose(0, 2, 1, 3)
    s = jnp.einsum("bhqd,bhkd->bhqk", q, k) * scale + mask
    p = jax.nn.softmax(s, axis=-1)
    o = jnp.einsum("bhqk,bhkd->bhqd", p, v)
    o = o.transpose(0, 2, 1, 3).reshape(bz, Lq, d_model)
    return o @ params["fc_w"].T + params["fc_b"]


# ----------------------------------------------------------------------------

if __name__ == "__main__":
    bz, seq, d_model, n_heads = 2, 8, 32, 4
    hd = d_model // n_heads

    key = jax.random.PRNGKey(0)
    kp, kq, kk, kv = jax.random.split(key, 4)

    params = init_sdpa_params(kp, d_model)
    Q = jax.random.normal(kq, (bz, seq, d_model), jnp.float32)
    K = jax.random.normal(kk, (bz, seq, d_model), jnp.float32)
    V = jax.random.normal(kv, (bz, seq, d_model), jnp.float32)

    # Additive causal mask, shape (bz, 1, Lq, Lk)
    causal = jnp.tril(jnp.ones((seq, seq), jnp.bool_))
    mask = jnp.where(causal, 0.0, -1e9).astype(jnp.float32)[None, None, :, :]
    mask = jnp.broadcast_to(mask, (bz, 1, seq, seq))

    cos, sin = precompute_freqs_cos_sin(hd, seq)

    ref = sdpa_reference(params, Q, K, V, mask, cos, sin, n_heads=n_heads)

    # f32 path (exact parity with the reference; exact softmax divide).
    out = sdpa_forward(params, Q, K, V, mask, cos, sin, n_heads=n_heads,
                       compute_dtype=jnp.float32)
    out = jax.block_until_ready(out)
    assert out.shape == (bz, seq, d_model)
    assert jnp.allclose(out, ref, atol=2e-3, rtol=2e-3), "f32 Pallas output mismatch"

    # bf16 MXU-operand path (default; f32 accumulation / softmax, looser tolerance).
    out_bf16 = sdpa_forward(params, Q, K, V, mask, cos, sin, n_heads=n_heads,
                            compute_dtype=jnp.bfloat16)
    out_bf16 = jax.block_until_ready(out_bf16)
    assert jnp.allclose(out_bf16.astype(jnp.float32), ref, atol=5e-2, rtol=5e-2), \
        "bf16 Pallas output mismatch"

    print("KERNEL_OK")
</pallas_src>

<mosaic_0001>
module attributes {stable_mosaic.version = 11 : i64} {
  func.func @_proj_kernel(%arg0: i32, %arg1: i32, %arg2: i32, %arg3: i32, %arg4: memref<1x8x32xf32, #tpu.memory_space<vmem>>, %arg5: memref<32x32xf32, #tpu.memory_space<vmem>>, %arg6: memref<1x32xf32, #tpu.memory_space<vmem>>, %arg7: memref<8x32xf32, #tpu.memory_space<vmem>>, %arg8: memref<8x32xf32, #tpu.memory_space<vmem>>, %arg9: memref<8x32xf32, #tpu.memory_space<vmem>>, %arg10: memref<1x8x32xf32, #tpu.memory_space<vmem>>, %arg11: memref<8x32xf32, #tpu.memory_space<vmem>>) attributes {dimension_semantics = [#tpu.dimension_semantics<parallel>, #tpu.dimension_semantics<parallel>, #tpu.dimension_semantics<parallel>, #tpu.dimension_semantics<arbitrary>], iteration_bounds = array<i64: 2, 1, 1, 1>, scalar_prefetch = 0 : i64, scratch_operands = 1 : i64, tpu.core_type = #tpu.core_type<tc>, window_params = [{transform_indices = @transform_0, window_bounds = array<i64: 1, 8, 32>}, {transform_indices = @transform_1, window_bounds = array<i64: 32, 32>}, {transform_indices = @transform_2, window_bounds = array<i64: 1, 32>}, {transform_indices = @transform_3, window_bounds = array<i64: 8, 32>}, {transform_indices = @transform_4, window_bounds = array<i64: 8, 32>}, {transform_indices = @transform_5, window_bounds = array<i64: 8, 32>}, {transform_indices = @transform_6, window_bounds = array<i64: 1, 8, 32>}]} {
    %c0_i32 = arith.constant 0 : i32
    %0 = arith.cmpi eq, %arg3, %c0_i32 : i32
    %1 = arith.extui %0 : i1 to i32
    %c0_i32_0 = arith.constant 0 : i32
    %2 = arith.cmpi ne, %1, %c0_i32_0 : i32
    scf.if %2 {
      %cst_11 = arith.constant 0.000000e+00 : f32
      %13 = vector.broadcast %cst_11 : f32 to vector<8x32xf32>
      %c0_12 = arith.constant 0 : index
      %c0_13 = arith.constant 0 : index
      %14 = vector.load %arg11[%c0_12, %c0_13] : memref<8x32xf32, #tpu.memory_space<vmem>>, vector<8x32xf32>
      tpu.vector_store %arg11[%c0_12, %c0_13], %13 {strides = array<i32>} : memref<8x32xf32, #tpu.memory_space<vmem>>, vector<8x32xf32>,
    } else {
    }
    %c0 = arith.constant 0 : index
    %c0_1 = arith.constant 0 : index
    %c0_2 = arith.constant 0 : index
    %3 = vector.load %arg4[%c0, %c0_1, %c0_2] : memref<1x8x32xf32, #tpu.memory_space<vmem>>, vector<1x8x32xf32>
    %4 = vector.shape_cast %3 : vector<1x8x32xf32> to vector<8x32xf32>
    %c0_3 = arith.constant 0 : index
    %c0_4 = arith.constant 0 : index
    %5 = vector.load %arg5[%c0_3, %c0_4] : memref<32x32xf32, #tpu.memory_space<vmem>>, vector<32x32xf32>
    %c0_5 = arith.constant 0 : index
    %c0_6 = arith.constant 0 : index
    %6 = vector.load %arg11[%c0_5, %c0_6] : memref<8x32xf32, #tpu.memory_space<vmem>>, vector<8x32xf32>
    %cst = arith.constant dense<0.000000e+00> : vector<8x32xf32>
    %7 = tpu.matmul %4, %5, %cst {dimension_numbers = #tpu.dot_dimension_numbers<[1], [0], [0], [1], [0, 0, 1, 1], [], []>} : vector<8x32xf32>, vector<32x32xf32>, vector<8x32xf32> -> vector<8x32xf32>
    %8 = arith.addf %6, %7 : vector<8x32xf32>
    %c0_7 = arith.constant 0 : index
    %c0_8 = arith.constant 0 : index
    %9 = vector.load %arg11[%c0_7, %c0_8] : memref<8x32xf32, #tpu.memory_space<vmem>>, vector<8x32xf32>
    tpu.vector_store %arg11[%c0_7, %c0_8], %8 {strides = array<i32>} : memref<8x32xf32, #tpu.memory_space<vmem>>, vector<8x32xf32>,
    %c0_i32_9 = arith.constant 0 : i32
    %10 = arith.cmpi eq, %arg3, %c0_i32_9 : i32
    %11 = arith.extui %10 : i1 to i32
    %c0_i32_10 = arith.constant 0 : i32
    %12 = arith.cmpi ne, %11, %c0_i32_10 : i32
    scf.if %12 {
      %c0_11 = arith.constant 0 : index
      %c0_12 = arith.constant 0 : index
      %13 = vector.load %arg11[%c0_11, %c0_12] : memref<8x32xf32, #tpu.memory_space<vmem>>, vector<8x32xf32>
      %c0_13 = arith.constant 0 : index
      %c0_14 = arith.constant 0 : index
      %14 = vector.load %arg6[%c0_13, %c0_14] : memref<1x32xf32, #tpu.memory_space<vmem>>, vector<1x32xf32>
      %15 = vector.broadcast %14 : vector<1x32xf32> to vector<8x32xf32>
      %16 = arith.addf %13, %15 : vector<8x32xf32>
      %17 = vector.extract_strided_slice %16 {offsets = [0, 1], sizes = [8, 31], strides = [1, 1]} : vector<8x32xf32> to vector<8x31xf32>
      %18 = vector.extract_strided_slice %16 {offsets = [0, 0], sizes = [8, 1], strides = [1, 1]} : vector<8x32xf32> to vector<8x1xf32>
      %19 = tpu.concatenate %17, %18 in 1 : vector<8x31xf32>, vector<8x1xf32> -> vector<8x32xf32>
      %20 = vector.extract_strided_slice %16 {offsets = [0, 31], sizes = [8, 1], strides = [1, 1]} : vector<8x32xf32> to vector<8x1xf32>
      %21 = vector.extract_strided_slice %16 {offsets = [0, 0], sizes = [8, 31], strides = [1, 1]} : vector<8x32xf32> to vector<8x31xf32>
      %22 = tpu.concatenate %20, %21 in 1 : vector<8x1xf32>, vector<8x31xf32> -> vector<8x32xf32>
      %c0_15 = arith.constant 0 : index
      %c0_16 = arith.constant 0 : index
      %23 = vector.load %arg7[%c0_15, %c0_16] : memref<8x32xf32, #tpu.memory_space<vmem>>, vector<8x32xf32>
      %24 = arith.mulf %16, %23 : vector<8x32xf32>
      %c0_17 = arith.constant 0 : index
      %c0_18 = arith.constant 0 : index
      %25 = vector.load %arg8[%c0_17, %c0_18] : memref<8x32xf32, #tpu.memory_space<vmem>>, vector<8x32xf32>
      %26 = arith.mulf %19, %25 : vector<8x32xf32>
      %27 = arith.addf %24, %26 : vector<8x32xf32>
      %c0_19 = arith.constant 0 : index
      %c0_20 = arith.constant 0 : index
      %28 = vector.load %arg9[%c0_19, %c0_20] : memref<8x32xf32, #tpu.memory_space<vmem>>, vector<8x32xf32>
      %29 = arith.mulf %22, %28 : vector<8x32xf32>
      %30 = arith.addf %27, %29 : vector<8x32xf32>
      %c0_21 = arith.constant 0 : index
      %c0_22 = arith.constant 0 : index
      %c0_23 = arith.constant 0 : index
      %31 = vector.load %arg10[%c0_21, %c0_22, %c0_23] : memref<1x8x32xf32, #tpu.memory_space<vmem>>, vector<1x8x32xf32>
      %32 = vector.shape_cast %31 : vector<1x8x32xf32> to vector<8x32xf32>
      %33 = vector.shape_cast %30 : vector<8x32xf32> to vector<1x8x32xf32>
      tpu.vector_store %arg10[%c0_21, %c0_22, %c0_23], %33 {strides = array<i32>} : memref<1x8x32xf32, #tpu.memory_space<vmem>>, vector<1x8x32xf32>,
    } else {
    }
    return
  }
  func.func @transform_0(%arg0: i32, %arg1: i32, %arg2: i32, %arg3: i32) -> (i32, i32, i32) {
    %c0_i32 = arith.constant 0 : i32
    return %arg0, %arg1, %arg3 : i32, i32, i32
  }
  func.func @transform_1(%arg0: i32, %arg1: i32, %arg2: i32, %arg3: i32) -> (i32, i32) {
    %c0_i32 = arith.constant 0 : i32
    return %arg3, %arg2 : i32, i32
  }
  func.func @transform_2(%arg0: i32, %arg1: i32, %arg2: i32, %arg3: i32) -> (i32, i32) {
    %c0_i32 = arith.constant 0 : i32
    %c0_i32_0 = arith.constant 0 : i32
    return %c0_i32, %arg2 : i32, i32
  }
  func.func @transform_3(%arg0: i32, %arg1: i32, %arg2: i32, %arg3: i32) -> (i32, i32) {
    %c0_i32 = arith.constant 0 : i32
    %c0_i32_0 = arith.constant 0 : i32
    return %arg1, %c0_i32 : i32, i32
  }
  func.func @transform_4(%arg0: i32, %arg1: i32, %arg2: i32, %arg3: i32) -> (i32, i32) {
    %c0_i32 = arith.constant 0 : i32
    %c0_i32_0 = arith.constant 0 : i32
    return %arg1, %c0_i32 : i32, i32
  }
  func.func @transform_5(%arg0: i32, %arg1: i32, %arg2: i32, %arg3: i32) -> (i32, i32) {
    %c0_i32 = arith.constant 0 : i32
    %c0_i32_0 = arith.constant 0 : i32
    return %arg1, %c0_i32 : i32, i32
  }
  func.func @transform_6(%arg0: i32, %arg1: i32, %arg2: i32, %arg3: i32) -> (i32, i32, i32) {
    %c0_i32 = arith.constant 0 : i32
    return %arg0, %arg1, %arg2 : i32, i32, i32
  }
}

</mosaic_0001>

<bundles_post_ra>
// kernel: tpu_custom_call.1
= control target key start
LH: loop header
LB: loop body
LE: loop exit
PB: predicated region body
PF: predicated region fallthrough
CT: control target
= control target key end

     0   :  { %s1278_s0 = inlined_call_operand.hbm [shape: f32[2,8,32], index: 0, kind: input, shape index: {}]   ;;  %s1279_s1 = inlined_call_operand.hbm [shape: f32[32,32], index: 1, kind: input, shape index: {}]   ;;  %s1280_s2 = inlined_call_operand.vmem [shape: f32[1,32], index: 2, kind: input, shape index: {}]   ;;  %s1281_s3 = inlined_call_operand.hbm [shape: f32[8,32], index: 3, kind: input, shape index: {}]   ;;  %s1282_s4 = inlined_call_operand.hbm [shape: f32[8,32], index: 4, kind: input, shape index: {}]   ;;  %s1283_s5 = inlined_call_operand.vmem [shape: f32[8,32], index: 5, kind: input, shape index: {}]   ;;  %s1284_s6 = inlined_call_operand.hbm [shape: f32[2,8,32], index: 6, kind: output, shape index: {}]  }
   0x1   :  { %1289 = sst [smem:[#allocation16_spill]] %s1279_s1 }
   0x2   :  { %1290 = sst [smem:[#allocation17_spill]] %s1281_s3 }
   0x3   :  { %11 = vsyncpa [#allocation4], 0 }
   0x4   :  { %13 = vsyncpa [#allocation4 + $0x1], 0 }
   0x5   :  { %14 = vsyncpa [#allocation7], 0 }
   0x6   :  { %15 = vsyncpa [#allocation10], 0 }
   0x7   :  { %16 = vsyncpa [#allocation5], 0 }
   0x8   :  { %18 = vsyncpa [#allocation5 + $0x1], 0  ;;  %s1078_s21 = smov 0   ;;  %s1080_s22 = smov 0  }
   0x9   :  { %s1082_s23 = smov 0   ;;  %s1084_s24 = smov 0  }
   0xa   :  { %s1086_s25 = smov 0   ;;  %s1088_s26 = smov 0  }
   0xb LB: > { %s694_s27 = sadd.s32 4294967295, %s1028_s26   ;;  %s695_s28 = sadd.s32 4294967294, %s1028_s26   ;;  %s1028_s26 = sphi %s1088_s26, %s24_s26   ;;  %s1024_s25 = sphi %s1086_s25, %s1310_s25   ;;  %s1020_s24 = sphi %s1084_s24, %s1309_s24   ;;  %s1016_s23 = sphi %s1082_s23, %s1308_s23   ;;  %s1012_s22 = sphi %s1080_s22, %s1307_s22   ;;  %s1008_s21 = sphi %s1078_s21, %s1306_s21  }
   0xc   : > { %p74_p0 = scmp.ne.s32.totalorder %s1012_s22, %s1008_s21  ;;  %p1112_p1 = scmp.eq.s32.totalorder %s694_s27, 0 }
   0xd   : > { %p1116_p2 = scmp.eq.s32.totalorder %s694_s27, 1  ;;  %p240_p3 = scmp.eq.s32.totalorder %s695_s28, 1 }
   0xe   : > { %s1291_s29 = scalar_select %p1112_p1, 1, 0 }
   0xf   : > { %p1122_p4 = por %p1112_p1, %p74_p0  ;;  %p696_p5 = scmp.ge.s32.totalorder %s1028_s26, 1 }
  0x10   : > { %p1127_p6 = por %p240_p3, %p74_p0  ;;  %p247_p7 = scmp.lt.s32.totalorder %s1028_s26, 3 }
  0x11   : > { %s1293_s7 = scalar_select %p1122_p4, 1, 0 }
  0x12   : > { %s1294_s8 = scalar_select %p1127_p6, 1, 0 }
  0x13   : > { %p1132_p8 = pnand %p696_p5, %p247_p7  ;;  %s1030_s10 = smov [#allocation6]  }
  0x14   : > { %s263_s11 = sshll.u32 %s1030_s10, 4  ;;  %s1031_s13 = smov [#allocation8]   ;;  %s264_s11 = int_to_ptr.vmem [resolvable:$true] %s263_s11 }
  0x15   : > { %s1295_s9 = scalar_select %p1132_p8, 1, 0 }
  0x16   : > { %p749_p9 = pneg %p1132_p8  ;;  %s285_s14 = sshll.u32 %s1031_s13, 4  ;;  %s286_s14 = int_to_ptr.vmem [resolvable:$true] %s285_s14 }
  0x17   : > { %s1032_s15 = smov [#allocation9]   ;;  %s845_s17 = scalar_lea.vmem %s264_s11, 512 }
  0x18   : > { %p1141_p11 = pnand %p749_p9, %p1112_p1  ;;  %s298_s16 = sshll.u32 %s1032_s15, 4  ;;  %s299_s16 = int_to_ptr.vmem [resolvable:$true] %s298_s16 }
  0x19   : > { %p846_p13 = scmp.ne.s32.totalorder %s264_s11, %s845_s17  ;;  %p853_p5 = scmp.lt.s32.totalorder %s264_s11, %s264_s11 }
  0x1a   : > { %p836_p12 = pneg %p1141_p11  ;;  %p854_p7 = scmp.lt.s32.totalorder %s845_s17, %s845_s17 }
  0x1c   : > { %p848_p0 = pnand %p846_p13, %p836_p12  ;;  %p855_p9 = por %p854_p7, %p853_p5 }
  0x1e   : > { %p849_p3 = pneg %p848_p0 }
  0x20   : > { %p856_p10 = pnand %p855_p9, %p849_p3 }
  0x22   : > { %859 = shalt.err (!%p856_p10)
}
  0x23   : > { %s1033_s18 = smov 128   ;;  %s1034_s19 = smov 8  }
  0x24   : > { %s1297_s1 = sld [smem:[#allocation16_spill]]  ;;  %s871_s28 = scalar_lea.vmem %s286_s14, 128 }
  0x25   : > { %p872_p6 = scmp.ne.s32.totalorder %s286_s14, %s871_s28  ;;  %p879_p1 = scmp.lt.s32.totalorder %s286_s14, %s286_s14 }
  0x26   : > { %p880_p4 = scmp.lt.s32.totalorder %s871_s28, %s871_s28 }
  0x27   : > { %p874_p13 = pnand %p872_p6, %p836_p12 }
  0x28   : > { %p881_p5 = por %p880_p4, %p879_p1 }
  0x29   : > { %p875_p0 = pneg %p874_p13 }
  0x2a   : > { %752 = dma.hbm_to_vmem [thread:$0]  (!%p1141_p11), %s1297_s1, 512, %s264_s11, [#allocation7], %s1033_s18, %s1033_s18, %s1034_s19  }
  0x2b   : > { %p882_p3 = pnand %p881_p5, %p875_p0 }
  0x2d   : > { %885 = shalt.err (!%p882_p3)
}
  0x2e   : > { %s1298_s3 = sld [smem:[#allocation17_spill]]  ;;  %s897_s11 = scalar_lea.vmem %s299_s16, 128 }
  0x2f   : > { %p898_p10 = scmp.ne.s32.totalorder %s299_s16, %s897_s11  ;;  %p905_p9 = scmp.lt.s32.totalorder %s299_s16, %s299_s16 }
  0x30   : > { %p906_p13 = scmp.lt.s32.totalorder %s897_s11, %s897_s11 }
  0x31   : > { %p900_p7 = pnand %p898_p10, %p836_p12 }
  0x32   : > { %p907_p8 = por %p906_p13, %p905_p9 }
  0x33   : > { %p901_p6 = pneg %p900_p7 }
  0x34   : > { %755 = dma.hbm_to_vmem [thread:$0]  (!%p1141_p11), %s1298_s3, 128, %s286_s14, [#allocation7]  }
  0x35   : > { %p908_p1 = pnand %p907_p8, %p901_p6 }
  0x37   : > { %911 = shalt.err (!%p908_p1)
}
  0x38   : > { %758 = dma.hbm_to_vmem [thread:$0]  (!%p1141_p11), %s1282_s4, 128, %s299_s16, [#allocation10]  }
  0x39   : > { %s61_s14 = sadd.s32 1, %s1016_s23  ;;  %s50_s18 = sadd.s32 1, %s1024_s25 }
  0x3a   : > { %p68_p4 = scmp.ne.s32.totalorder %s1016_s23, %s1012_s22  ;;  %p52_p8 = scmp.ge.s32.totalorder %s50_s18, 2 }
  0x3b   : > { %p69_p12 = scmp.eq.s32.totalorder %s1028_s26, 0  ;;  %p770_p5 = scmp.lt.s32.totalorder %s1028_s26, 2 }
  0x3c   : > { %p1178_p0 = por %p1116_p2, %p68_p4  ;;  %s1312_s18 = smov (%p52_p8, %s50_s18), 0 }
  0x3d   : > { %p70_p3 = por %p69_p12, %p68_p4  ;;  %s316_s19 = sand.u32 1, %s1016_s23  }
  0x3e   : > { %s54_s20 = ssub.s32 %s1024_s25, %s1312_s18  ;;  %s703_s16 = sshll.u32 %s316_s19, 3 }
  0x3f   : > { %p59_p10 = scmp.eq.s32.totalorder %s54_s20, 0  ;;  %s704_s27 = sshll.u32 %s1024_s25, 7 }
  0x40   : > { %s327_s30 = scalar_lea.hbm %s1278_s0, %s704_s27  ;;  %s320_s11 = scalar_lea.vmem [#allocation3], %s703_s16 }
  0x41   : > { %s1190_s28 = scalar_select %p59_p10, %s1016_s23, %s61_s14  }
  0x42   : > { %s329_s15 = sshll.u32 %s320_s11, 4  ;;  %p1197_p2 = pnand %p770_p5, %p70_p3  ;;  %s330_s15 = int_to_ptr.vmem [resolvable:$true] %s329_s15 }
  0x43   : > { %s317_s1 = scalar_lea.sflag [#allocation4], %s316_s19  ;;  %s925_s20 = scalar_lea.vmem %s330_s15, 128 }
  0x44   : > { %p914_p11 = pneg %p1197_p2  ;;  %p926_p7 = scmp.ne.s32.totalorder %s330_s15, %s925_s20 }
  0x45   : > { %s1035_s14 = smov [#allocation3]  }
  0x46   : > { %p928_p6 = pnand %p926_p7, %p914_p11  ;;  %s930_s3 = sshll.u32 %s1035_s14, 4  ;;  %s931_s3 = int_to_ptr.vmem [resolvable:$false] %s930_s3 }
  0x47   : > { %s932_s27 = scalar_lea.vmem %s931_s3, 256  ;;  %p933_p13 = scmp.lt.s32.totalorder %s330_s15, %s931_s3 }
  0x48   : > { %p929_p9 = pneg %p928_p6  ;;  %p934_p1 = scmp.lt.s32.totalorder %s932_s27, %s925_s20 }
  0x4a   : > { %p935_p4 = por %p934_p1, %p933_p13 }
  0x4c   : > { %p936_p8 = pnand %p935_p4, %p929_p9 }
  0x4e   : > { %939 = shalt.err (!%p936_p8)
}
  0x4f   : > { %762 = dma.hbm_to_vmem [thread:$0]  (!%p1197_p2), %s327_s30, 128, %s330_s15, %s317_s1  }
  0x50   : > { %p1301_p12 = scmp.ne.s32.totalorder %s1295_s9, 0 }
  0x51   : > { %s1208_s19 = sand.u32 (!%p1301_p12), 1, %s1012_s22   ;;  %p1302_p5 = scmp.ne.s32.totalorder (!%p1301_p12), %s1293_s7, 0 }
  0x52   : > { %338 = sbr.rel (%p1301_p12) target bundleno = 446 (0x1be), region = 44  ;;  %s706_s16 = sshll.u32 (!%p1301_p12), %s1208_s19, 3 }
  0x53   : > { %s341_s10 = scalar_lea.sflag (!%p1301_p12), [#allocation4], %s1208_s19  ;;  %s344_s3 = scalar_lea.vmem (!%p1301_p12), [#allocation3], %s706_s16 }
  0x57   : > { %991 = dma.done.wait (%p1302_p5), %s341_s10, 128  }
  0x58   : > { %993 = vsyncadd (%p1302_p5), %s341_s10, 4294967168  ;;  %p1303_p3 = scmp.ne.s32.totalorder %s1291_s29, 0 }
  0x5a   : > { %995 = dma.done.wait (%p1303_p3), [#allocation7], 640  }
  0x5b   : > { %997 = vsyncadd (%p1303_p3), [#allocation7], 4294966656 }
  0x5c   : > { %999 = dma.done.wait (%p1303_p3), [#allocation10], 128  }
  0x5d   : > { %1001 = vsyncadd (%p1303_p3), [#allocation10], 4294967168  ;;  %vm404_vm0 = vcmask 261120   ;;  %v1036_v0 = vmov 0.0   ;;  %vm1037_vm1 = vmmov 0   ;;  %v410_v1 = vld [vmem:[#allocation6 + $0x18] sm:$0xff] }
  0x5e   : > { %722 = vmatprep.subr.mxu0 %v1036_v0  ;;  %730 = vmatprep.mubr.msk.f32.mxu0 %vm1037_vm1, %v1036_v0  ;;  %405 = vst.msk [vmem:[#allocation2] sm:$0xff] %vm404_vm0, %v1036_v0  ;;  %v409_v2 = vld [vmem:[#allocation6 + $0x10] sm:$0xff]  ;;  %v408_v3 = vld [vmem:[#allocation6 + $0x8] sm:$0xff]  ;;  %v407_v4 = vld [vmem:[#allocation6] sm:$0xff]  ;;  %s1038_s7 = smov 97   ;;  %s1039_s9 = smov 127  }
  0x5f   : > { %723 = vmatpush3.msra.mxu0 %v410_v1  ;;  %v406_v5 = vld [vmem:[%s344_s3] sm:$0xff]  ;;  %v712_v10 = vld [vmem:[%s1280_s2] ss:$0 sm:$0xff]  ;;  %s1040_s13 = smov 1   ;;  %s1041_s30 = smov 31   ;;  %vm515_vm2 = vcmask 7168  }
  0x60   : > { %724 = vmatprep.subr.mxu0 %v1036_v0  ;;  %vm507_vm3 = vcmask 252928   ;;  %v517_v15 = vld [vmem:[#allocation8] sm:$0xff]  ;;  %v519_v16 = vld [vmem:[#allocation9] sm:$0xff]  ;;  %s714_s17 = sshll.u32 %s1020_s24, 7  ;;  %s391_s20 = scalar_lea.vmem [#allocation11], %s706_s16 }
  0x61   : > { %725 = vmatpush3.msra.mxu0 %v409_v2  ;;  %v522_v19 = vld [vmem:[%s1283_s5] sm:$0xff]  ;;  %s542_s14 = sshll.u32 %s391_s20, 4  ;;  %s540_s3 = scalar_lea.hbm %s1284_s6, %s714_s17  ;;  %s543_s14 = int_to_ptr.vmem [resolvable:$true] %s542_s14 }
  0x62   : > { %726 = vmatprep.subr.mxu0 %v1036_v0  ;;  %s527_s1 = scalar_lea.sflag [#allocation5], %s1208_s19  ;;  %s940_s29 = scalar_lea.vmem %s543_s14, 128 }
  0x63   : > { %727 = vmatpush3.msra.mxu0 %v408_v3  ;;  %p941_p10 = scmp.ne.s32.totalorder %s543_s14, %s940_s29  ;;  %s1042_s24 = smov [#allocation11]  }
  0x64   : > { %728 = vmatprep.subr.mxu0 %v1036_v0 }
  0x65   : > { %729 = vmatpush3.msra.mxu0 %v407_v4  ;;  %v411_v6 = vld [vmem:[#allocation2] sm:$0xff]  ;;  %p942_p2 = pnand %p941_p10, %p1178_p0 }
  0x66   : > { %731 = vmatmul.mubr.msk.f32.vlgmr.msra.gmra.mxu0 %vm404_vm0, %v406_v5 }
  0x67   : > { %p943_p11 = pneg %p942_p2 }
 0x126   : > { %v482_v7 = vpop.f32.mrf.mxu0 }
 0x127   : > { %v486_v8 = vadd.f32 %v482_v7, %v411_v6 }
 0x128   : > { %v732_v9 = vpop.f32.mrf.mxu0 }
 0x129   : > { %487 = vst.msk [vmem:[#allocation2] sm:$0xff] %vm404_vm0, %v486_v8 }
 0x130   : > { %v491_v11 = vld [vmem:[#allocation2] sm:$0xff] }
 0x131   : > { %v499_v12 = vadd.f32 %v712_v10, %v491_v11 }
 0x133   : > { %509 = vrot.lane.b32.xlu1 %v499_v12, %s1038_s7  ;;  %501 = vrot.lane.b32.xlu0 %v499_v12, %s1039_s9  ;;  %v518_v22 = vmul.f32 %v517_v15, %v499_v12  ;;  %s944_s7 = sshll.u32 %s1042_s24, 4  ;;  %s945_s7 = int_to_ptr.vmem [resolvable:$false] %s944_s7 }
 0x134   : > { %s946_s16 = scalar_lea.vmem %s945_s7, 256  ;;  %p947_p7 = scmp.lt.s32.totalorder %s543_s14, %s945_s7 }
 0x135   : > { %p948_p6 = scmp.lt.s32.totalorder %s946_s16, %s940_s29 }
 0x137   : > { %512 = vrot.lane.b32.xlu1 %v499_v12, %s1040_s13  ;;  %504 = vrot.lane.b32.xlu0 %v499_v12, %s1041_s30  ;;  %p949_p9 = por %p948_p6, %p947_p7 }
 0x139   : > { %p950_p13 = pnand %p949_p9, %p943_p11 }
 0x1a5   : > { %v510_v13 = vpop.permute.xlu1 %509  ;;  %v502_v14 = vpop.permute.xlu0 %501 }
 0x1a9   : > { %v513_v17 = vpop.permute.xlu1 %512  ;;  %v505_v18 = vpop.permute.xlu0 %504 }
 0x1aa   : > { %v516_v20 = vsel %vm515_vm2, %v510_v13, %v513_v17  ;;  %v508_v21 = vsel %vm507_vm3, %v502_v14, %v505_v18 }
 0x1ab   : > { %v520_v23 = vmul.f32 %v519_v16, %v508_v21  ;;  %v523_v24 = vmul.f32 %v522_v19, %v516_v20 }
 0x1ad   : > { %v521_v25 = vadd.f32 %v520_v23, %v518_v22 }
 0x1af   : > { %v524_v26 = vadd.f32 %v523_v24, %v521_v25 }
 0x1b1   : > { %525 = vst.msk [vmem:[%s391_s20] sm:$0xff] %vm404_vm0, %v524_v26 }
 0x1b2   : > { %953 = shalt.err (!%p950_p13)
}
 0x1b3   : > { %s954_s9 = scalar_lea.hbm %s540_s3, 128  ;;  %s958_s30 = scalar_lea.hbm %s1284_s6, 256 }
 0x1b4   : > { %p955_p1 = scmp.ne.s32.totalorder %s540_s3, %s954_s9  ;;  %p959_p12 = scmp.lt.s32.totalorder %s540_s3, %s1284_s6 }
 0x1b5   : > { %p960_p5 = scmp.lt.s32.totalorder %s958_s30, %s954_s9 }
 0x1b6   : > { %p956_p4 = pnand %p955_p1, %p1178_p0 }
 0x1b7   : > { %p961_p3 = por %p960_p5, %p959_p12 }
 0x1b8   : > { %p957_p8 = pneg %p956_p4 }
 0x1ba   : > { %p962_p10 = pnand %p961_p3, %p957_p8 }
 0x1bc   : > { %965 = shalt.err (!%p962_p10)
}
 0x1bd   : > { %747 = dma.vmem_to_hbm [thread:$0]  (%p1178_p0), %s543_s14, 128, %s540_s3, %s527_s1  }
 0x1be PF: > { %s554_s17 = sand.u32 1, %s1008_s21   ;;  %p1304_p2 = scmp.ne.s32.totalorder %s1294_s8, 0 }
 0x1bf   : > { %p1305_p11 = scmp.ge.s32.totalorder %s1028_s26, 2  ;;  %s555_s20 = scalar_lea.sflag [#allocation5], %s554_s17 }
 0x1c1   : > { %p764_p7 = pnand %p1305_p11, %p1304_p2 }
 0x1c3   : > { %p765_p6 = pneg %p764_p7 }
 0x1c5   : > { %1003 = dma.done.wait (%p765_p6), %s555_s20, 128  }
 0x1c6   : > { %1005 = vsyncadd (%p765_p6), %s555_s20, 4294967168  ;;  %s24_s26 = sadd.s32 1, %s1028_s26   ;;  %s1306_s21 = smov %s1012_s22 }
 0x1c7   : > { %p21_p9 = scmp.ge.s32.totalorder %s24_s26, 4   ;;  %s1307_s22 = smov %s1016_s23 }
 0x1c8   : > { %s1308_s23 = smov %s1190_s28  ;;  %s1309_s24 = smov %s1024_s25 }
 0x1c9   : > { %s1310_s25 = smov %s1312_s18  ;;  %23 = sbr.rel (!%p21_p9) target bundleno = 11 (0xb), region = 118 }
 0x1ce   :  { %560 = vsyncpa [#allocation4], 1 }
 0x1cf   :  { %562 = vsyncpa [#allocation4 + $0x1], 1 }
 0x1d0   :  { %563 = vsyncpa [#allocation7], 1 }
 0x1d1   :  { %564 = vsyncpa [#allocation10], 1 }
 0x1d2   :  { %565 = vsyncpa [#allocation5], 1 }
 0x1d3   :  { %567 = vsyncpa [#allocation5 + $0x1], 1 }

</bundles_post_ra>
